<compile_context>
chip_gen: v7x
topology: tpu7x:2x2x1
jax: 0.10.0
libtpu: 0.0.40
codegen_flags: <defaults>
</compile_context>

<pallas_src>
import functools
import math

import jax
import jax.numpy as jnp
from jax import lax
from jax.experimental import pallas as pl
from jax.experimental.pallas import tpu as pltpu

_LANE = 128
_SUB = 8
_MAX_TILE_ROWS = 2048  # (2048,128) f32 = 1 MiB per block
_MIN_GRID = 4          # aim for >= 4 grid steps so v7x megacore has work to shard


def _round_up(a: int, b: int) -> int:
    return -(-a // b) * b


def _cdiv(a: int, b: int) -> int:
    return -(-a // b)


def _modulator_pow(base, gamma: float):
    """(1 - p_t) ** gamma, strength-reduced for non-negative integer gamma."""
    g = float(gamma)
    if g.is_integer() and g >= 0.0:
        gi = int(g)
        if gi == 0:
            return jnp.ones_like(base)
        result = base
        for _ in range(gi - 1):
            result = result * base
        return result
    # Non-integer gamma with a negative base yields NaN — same quirk as torch.
    return base ** g


def _focal_loss_core(x, t, alpha: float, gamma: float):
    """Elementwise focal loss in f32 (same quirky semantics as the module:
    p_t is computed from the raw `inputs`, not sigmoid probabilities)."""
    xt = x * t  # reused below (review: trim VALU work)
    # F.binary_cross_entropy_with_logits(x, t, reduction='none'), stable form:
    # max(x, 0) - x*t + log1p(exp(-|x|))
    ce = jnp.maximum(x, 0.0) - xt + jnp.log1p(jnp.exp(-jnp.abs(x)))
    # 1 - p_t where p_t = x*t + (1-x)*(1-t)  ==>  1 - p_t = x + t - 2*x*t
    one_minus_pt = x + t - 2.0 * xt
    loss = ce * _modulator_pow(one_minus_pt, gamma)
    if alpha >= 0:
        # alpha_t = alpha*t + (1-alpha)*(1-t) = (1-alpha) + (2*alpha-1)*t
        loss = ((1.0 - alpha) + (2.0 * alpha - 1.0) * t) * loss
    return loss


def _focal_loss_kernel(x_ref, t_ref, o_ref, *, alpha: float, gamma: float):
    x = x_ref[...].astype(jnp.float32)
    t = t_ref[...].astype(jnp.float32)
    o_ref[...] = _focal_loss_core(x, t, alpha, gamma).astype(o_ref.dtype)


def _focal_loss_partial_sum_kernel(x_ref, t_ref, o_ref, *,
                                   alpha: float, gamma: float,
                                   tile_rows: int, tail_valid: int,
                                   needs_mask: bool):
    """Each grid step writes an independent (8,128) f32 partial sum.

    Sublane folding (reshape + sum over the leading axis) is pure VPU work; the
    expensive cross-lane reduction is deferred to a tiny XLA reduce outside the
    kernel. Tail masking only runs on the last tile, with a tile-relative index.
    """
    x = x_ref[...].astype(jnp.float32)
    t = t_ref[...].astype(jnp.float32)
    loss = _focal_loss_core(x, t, alpha, gamma)

    def fold(v):
        return v.reshape(tile_rows // _SUB, _SUB, _LANE).sum(axis=0)

    if needs_mask:
        i = pl.program_id(0)
        last = pl.num_programs(0) - 1

        @pl.when(i != last)
        def _():
            o_ref[...] = fold(loss)

        @pl.when(i == last)
        def _():
            row = lax.broadcasted_iota(jnp.int32, loss.shape, 0)
            lane = lax.broadcasted_iota(jnp.int32, loss.shape, 1)
            in_tile = row * _LANE + lane  # tile-relative: no int32 overflow
            o_ref[...] = fold(jnp.where(in_tile < tail_valid, loss, 0.0))
    else:
        o_ref[...] = fold(loss)


def _prepare_slab(inputs, targets):
    """Flatten to a lane-dense (rows, 128) slab; pad only when misaligned."""
    n = int(math.prod(inputs.shape))
    rows = max(1, _cdiv(n, _LANE))
    rows_pad = _round_up(rows, _SUB)
    n_pad = rows_pad * _LANE
    x = inputs.reshape(-1)
    t = targets.reshape(-1)
    if n_pad != n:
        # NOTE: full extra HBM read+write of each input for misaligned shapes.
        x = jnp.pad(x, (0, n_pad - n))
        t = jnp.pad(t, (0, n_pad - n))
    return x.reshape(rows_pad, _LANE), t.reshape(rows_pad, _LANE), n, rows_pad


def _pick_tile_rows(rows_pad: int) -> int:
    """Largest-reasonable tile that still yields >= _MIN_GRID grid steps when
    the input allows, multiple of 8 sublanes, capped for VMEM."""
    target = _round_up(max(1, _cdiv(rows_pad, _MIN_GRID)), _SUB)
    return max(_SUB, min(_MAX_TILE_ROWS, target))


def focal_loss(inputs: jnp.ndarray,
               targets: jnp.ndarray,
               alpha: float = 0.25,
               gamma: float = 2.0,
               reduction: str = "none") -> jnp.ndarray:
    assert inputs.shape == targets.shape
    if reduction not in ("none", "mean", "sum"):
        raise ValueError(
            f"Invalid Value for arg 'reduction': '{reduction}' "
            "\n Supported reduction modes: 'none', 'mean', 'sum'")

    orig_shape = inputs.shape
    orig_dtype = inputs.dtype

    x, t, n, rows_pad = _prepare_slab(inputs, targets)
    tile_rows = _pick_tile_rows(rows_pad)
    grid_r = _cdiv(rows_pad, tile_rows)

    in_specs = [
        pl.BlockSpec((tile_rows, _LANE), lambda i: (i, 0)),
        pl.BlockSpec((tile_rows, _LANE), lambda i: (i, 0)),
    ]

    if reduction == "none":
        kernel = functools.partial(_focal_loss_kernel,
                                   alpha=float(alpha), gamma=float(gamma))
        out = pl.pallas_call(
            kernel,
            out_shape=jax.ShapeDtypeStruct((rows_pad, _LANE), orig_dtype),
            grid_spec=pltpu.PrefetchScalarGridSpec(
                num_scalar_prefetch=0,
                grid=(grid_r,),
                in_specs=in_specs,
                out_specs=pl.BlockSpec((tile_rows, _LANE), lambda i: (i, 0)),
            ),
            compiler_params=pltpu.CompilerParams(
                dimension_semantics=("parallel",)),
        )(x, t)
        loss = out.reshape(-1)
        if loss.shape[0] != n:
            loss = loss[:n]
        return loss.reshape(orig_shape)

    # Fused 'mean' / 'sum': independent per-tile (8,128) partials on a
    # "parallel" axis (both v7x TCs participate); tiny final reduce in XLA.
    tail_valid = int(n - (grid_r - 1) * tile_rows * _LANE)
    needs_mask = (n != grid_r * tile_rows * _LANE)
    kernel = functools.partial(_focal_loss_partial_sum_kernel,
                               alpha=float(alpha), gamma=float(gamma),
                               tile_rows=tile_rows, tail_valid=tail_valid,
                               needs_mask=needs_mask)
    partials = pl.pallas_call(
        kernel,
        out_shape=jax.ShapeDtypeStruct((grid_r * _SUB, _LANE), jnp.float32),
        grid_spec=pltpu.PrefetchScalarGridSpec(
            num_scalar_prefetch=0,
            grid=(grid_r,),
            in_specs=in_specs,
            out_specs=pl.BlockSpec((_SUB, _LANE), lambda i: (i, 0)),
        ),
        compiler_params=pltpu.CompilerParams(
            dimension_semantics=("parallel",)),
    )(x, t)
    total = jnp.sum(partials)
    if reduction == "mean":
        total = total / jnp.float32(n)
    return total.astype(orig_dtype)


def _focal_loss_ref(inputs, targets, alpha=0.25, gamma=2.0, reduction="none"):
    x = inputs.astype(jnp.float32)
    t = targets.astype(jnp.float32)
    ce = jnp.maximum(x, 0.0) - x * t + jnp.log1p(jnp.exp(-jnp.abs(x)))
    p_t = x * t + (1.0 - x) * (1.0 - t)
    loss = ce * (1.0 - p_t) ** gamma
    if alpha >= 0:
        alpha_t = alpha * t + (1.0 - alpha) * (1.0 - t)
        loss = alpha_t * loss
    if reduction == "mean":
        loss = loss.mean()
    elif reduction == "sum":
        loss = loss.sum()
    return loss.astype(inputs.dtype)


if __name__ == "__main__":
    key = jax.random.PRNGKey(0)
    k1, k2, k3, k4 = jax.random.split(key, 4)

    # NCHW, small shapes: batch=2, channels=4, spatial=16x16 (128-aligned).
    inputs = jax.random.normal(k1, (2, 4, 16, 16), dtype=jnp.float32)
    targets = (jax.random.uniform(k2, (2, 4, 16, 16)) > 0.5).astype(jnp.float32)

    # Elementwise path ('none', the module default).
    out = focal_loss(inputs, targets, alpha=0.25, gamma=2.0, reduction="none")
    out = jax.block_until_ready(out)
    ref = _focal_loss_ref(inputs, targets, alpha=0.25, gamma=2.0, reduction="none")
    assert out.shape == inputs.shape
    assert jnp.allclose(out, ref, atol=1e-5, rtol=1e-5)

    # Fused reduction path (aligned, mask compiled out).
    out_mean = focal_loss(inputs, targets, alpha=0.25, gamma=2.0, reduction="mean")
    out_mean = jax.block_until_ready(out_mean)
    ref_mean = _focal_loss_ref(inputs, targets, alpha=0.25, gamma=2.0,
                               reduction="mean")
    assert jnp.allclose(out_mean, ref_mean, atol=1e-5, rtol=1e-5)

    # Misaligned shape exercises the pad + last-tile mask path.
    inputs2 = jax.random.normal(k3, (2, 3, 7, 5), dtype=jnp.float32)
    targets2 = (jax.random.uniform(k4, (2, 3, 7, 5)) > 0.5).astype(jnp.float32)
    out2 = focal_loss(inputs2, targets2, alpha=0.25, gamma=2.0, reduction="none")
    out2 = jax.block_until_ready(out2)
    ref2 = _focal_loss_ref(inputs2, targets2, alpha=0.25, gamma=2.0,
                           reduction="none")
    assert jnp.allclose(out2, ref2, atol=1e-5, rtol=1e-5)
    out2_sum = focal_loss(inputs2, targets2, alpha=0.25, gamma=2.0,
                          reduction="sum")
    out2_sum = jax.block_until_ready(out2_sum)
    ref2_sum = _focal_loss_ref(inputs2, targets2, alpha=0.25, gamma=2.0,
                               reduction="sum")
    assert jnp.allclose(out2_sum, ref2_sum, atol=1e-4, rtol=1e-5)

    print("KERNEL_OK")
</pallas_src>

<mosaic_0001>
module attributes {stable_mosaic.version = 11 : i64} {
  func.func @_focal_loss_kernel(%arg0: i32, %arg1: memref<8x128xf32, #tpu.memory_space<vmem>>, %arg2: memref<8x128xf32, #tpu.memory_space<vmem>>, %arg3: memref<8x128xf32, #tpu.memory_space<vmem>>) attributes {dimension_semantics = [#tpu.dimension_semantics<parallel>], iteration_bounds = array<i64: 2>, scalar_prefetch = 0 : i64, scratch_operands = 0 : i64, tpu.core_type = #tpu.core_type<tc>, window_params = [{transform_indices = @transform_0, window_bounds = array<i64: 8, 128>}, {transform_indices = @transform_1, window_bounds = array<i64: 8, 128>}, {transform_indices = @transform_2, window_bounds = array<i64: 8, 128>}]} {
    %c0 = arith.constant 0 : index
    %c0_0 = arith.constant 0 : index
    %0 = vector.load %arg1[%c0, %c0_0] : memref<8x128xf32, #tpu.memory_space<vmem>>, vector<8x128xf32>
    %c0_1 = arith.constant 0 : index
    %c0_2 = arith.constant 0 : index
    %1 = vector.load %arg2[%c0_1, %c0_2] : memref<8x128xf32, #tpu.memory_space<vmem>>, vector<8x128xf32>
    %2 = arith.mulf %0, %1 : vector<8x128xf32>
    %cst = arith.constant 0.000000e+00 : f32
    %3 = vector.broadcast %cst : f32 to vector<8x128xf32>
    %4 = arith.maximumf %0, %3 : vector<8x128xf32>
    %5 = arith.subf %4, %2 : vector<8x128xf32>
    %6 = math.absf %0 : vector<8x128xf32>
    %cst_3 = arith.constant 0.000000e+00 : f32
    %7 = vector.broadcast %cst_3 : f32 to vector<8x128xf32>
    %8 = arith.subf %7, %6 : vector<8x128xf32>
    %9 = math.exp %8 : vector<8x128xf32>
    %10 = math.log1p %9 : vector<8x128xf32>
    %11 = arith.addf %5, %10 : vector<8x128xf32>
    %12 = arith.addf %0, %1 : vector<8x128xf32>
    %cst_4 = arith.constant 2.000000e+00 : f32
    %13 = vector.broadcast %cst_4 : f32 to vector<8x128xf32>
    %14 = arith.mulf %13, %2 : vector<8x128xf32>
    %15 = arith.subf %12, %14 : vector<8x128xf32>
    %16 = arith.mulf %15, %15 : vector<8x128xf32>
    %17 = arith.mulf %11, %16 : vector<8x128xf32>
    %cst_5 = arith.constant -5.000000e-01 : f32
    %18 = vector.broadcast %cst_5 : f32 to vector<8x128xf32>
    %19 = arith.mulf %18, %1 : vector<8x128xf32>
    %cst_6 = arith.constant 7.500000e-01 : f32
    %20 = vector.broadcast %cst_6 : f32 to vector<8x128xf32>
    %21 = arith.addf %20, %19 : vector<8x128xf32>
    %22 = arith.mulf %21, %17 : vector<8x128xf32>
    %c0_7 = arith.constant 0 : index
    %c0_8 = arith.constant 0 : index
    %23 = vector.load %arg3[%c0_7, %c0_8] : memref<8x128xf32, #tpu.memory_space<vmem>>, vector<8x128xf32>
    tpu.vector_store %arg3[%c0_7, %c0_8], %22 {strides = array<i32>} : memref<8x128xf32, #tpu.memory_space<vmem>>, vector<8x128xf32>,
    return
  }
  func.func @transform_0(%arg0: i32) -> (i32, i32) {
    %c0_i32 = arith.constant 0 : i32
    %c0_i32_0 = arith.constant 0 : i32
    return %arg0, %c0_i32 : i32, i32
  }
  func.func @transform_1(%arg0: i32) -> (i32, i32) {
    %c0_i32 = arith.constant 0 : i32
    %c0_i32_0 = arith.constant 0 : i32
    return %arg0, %c0_i32 : i32, i32
  }
  func.func @transform_2(%arg0: i32) -> (i32, i32) {
    %c0_i32 = arith.constant 0 : i32
    %c0_i32_0 = arith.constant 0 : i32
    return %arg0, %c0_i32 : i32, i32
  }
}

</mosaic_0001>

<bundles_post_ra>
// kernel: tpu_custom_call.1
= control target key start
LH: loop header
LB: loop body
LE: loop exit
PB: predicated region body
PF: predicated region fallthrough
CT: control target
= control target key end

     0   :  { %7 = vsyncpa [#allocation3], 0  ;;  %s765_s0 = inlined_call_operand.hbm [shape: f32[16,128], index: 0, kind: input, shape index: {}]   ;;  %s766_s1 = inlined_call_operand.hbm [shape: f32[16,128], index: 1, kind: input, shape index: {}]   ;;  %s767_s2 = inlined_call_operand.hbm [shape: f32[16,128], index: 2, kind: output, shape index: {}]  }
   0x1   :  { %9 = vsyncpa [#allocation3 + $0x1], 0 }
   0x2   :  { %10 = vsyncpa [#allocation6], 0 }
   0x3   :  { %12 = vsyncpa [#allocation6 + $0x1], 0 }
   0x4   :  { %13 = vsyncpa [#allocation4], 0 }
   0x5   :  { %15 = vsyncpa [#allocation4 + $0x1], 0  ;;  %s551_s9 = smov 0   ;;  %s553_s10 = smov 0  }
   0x6   :  { %s555_s11 = smov 0   ;;  %s557_s12 = smov 0  }
   0x7 LB: > { %s572_s13 = sadd.s32 4294967295, %s531_s12   ;;  %s331_s14 = sadd.s32 4294967294, %s531_s12   ;;  %s531_s12 = sphi %s557_s12, %s786_s12   ;;  %s527_s11 = sphi %s555_s11, %s785_s11   ;;  %s523_s10 = sphi %s553_s10, %s784_s10   ;;  %s519_s9 = sphi %s551_s9, %s783_s9  }
   0x8   : > { %s576_s15 = sadd.s32 1, %s531_s12   ;;  %s28_s16 = sadd.s32 1, %s527_s11 }
   0x9   : > { %s25_s17 = ssub.s32 %s531_s12, %s576_s15  ;;  %p35_p0 = scmp.ne.s32.totalorder %s527_s11, %s523_s10 }
   0xa   : > { %p26_p1 = scmp.eq.s32.totalorder %s25_s17, 0  ;;  %p36_p2 = scmp.eq.s32.totalorder %s531_s12, 0 }
   0xb   : > { %p41_p3 = scmp.ne.s32.totalorder %s523_s10, %s519_s9  ;;  %p42_p4 = scmp.eq.s32.totalorder %s572_s13, 0 }
   0xc   : > { %s588_s18 = scalar_select %p26_p1, %s527_s11, %s28_s16  }
   0xd   : > { %p590_p5 = por %p36_p2, %p35_p0  ;;  %p594_p6 = por %p42_p4, %p41_p3 }
   0xe   : > { %p91_p7 = scmp.eq.s32.totalorder %s572_s13, 1  ;;  %p97_p8 = scmp.eq.s32.totalorder %s331_s14, 1 }
   0xf   : > { %s771_s20 = scalar_select %p594_p6, 1, 0 }
  0x10   : > { %p363_p10 = scmp.lt.s32.totalorder %s531_s12, 2  ;;  %p601_p11 = por %p91_p7, %p35_p0 }
  0x11   : > { %p605_p12 = por %p97_p8, %p41_p3  ;;  %s610_s23 = sand.u32 1, %s527_s11  }
  0x12   : > { %s772_s21 = scalar_select %p601_p11, 1, 0 }
  0x13   : > { %s773_s22 = scalar_select %p605_p12, 1, 0 }
  0x14   : > { %s335_s24 = sshll.u32 %s531_s12, 7  ;;  %s334_s25 = sshll.u32 %s610_s23, 3 }
  0x15   : > { %s619_s28 = scalar_lea.hbm %s765_s0, %s335_s24  ;;  %s121_s29 = scalar_lea.vmem [#allocation2], %s334_s25 }
  0x16   : > { %s128_s30 = sshll.u32 %s121_s29, 4  ;;  %p625_p13 = pnand %p363_p10, %p590_p5  ;;  %s629_s30 = int_to_ptr.vmem [resolvable:$true] %s128_s30 }
  0x17   : > { %s118_s4 = scalar_lea.sflag [#allocation3], %s610_s23  ;;  %s401_s5 = scalar_lea.hbm %s619_s28, 128 }
  0x18   : > { %p402_p2 = scmp.ne.s32.totalorder %s619_s28, %s401_s5  ;;  %p403_p3 = pneg %p625_p13 }
  0x19   : > { %s406_s8 = scalar_lea.hbm %s765_s0, 256  ;;  %p407_p5 = scmp.lt.u32.totalorder %s619_s28, %s765_s0 }
  0x1a   : > { %p404_p4 = pnand %p403_p3, %p402_p2  ;;  %p408_p8 = scmp.lt.u32.totalorder %s406_s8, %s401_s5 }
  0x1b   : > { %p410_p9 = scmp.lt.u32.totalorder %s401_s5, %s619_s28 }
  0x1c   : > { %p405_p7 = pneg %p404_p4  ;;  %p409_p10 = por %p408_p8, %p407_p5 }
  0x1e   : > { %p411_p0 = por %p410_p9, %p409_p10 }
  0x20   : > { %p412_p1 = pnand %p411_p0, %p405_p7 }
  0x22   : > { %415 = shalt.err (!%p412_p1)
}
  0x23   : > { %s416_s17 = scalar_lea.vmem %s629_s30, 128  ;;  %s533_s19 = smov [#allocation2]  }
  0x24   : > { %p417_p2 = scmp.ne.s32.totalorder %s629_s30, %s416_s17  ;;  %s421_s26 = sshll.u32 %s533_s19, 4  ;;  %s422_s26 = int_to_ptr.vmem [resolvable:$false] %s421_s26 }
  0x25   : > { %s423_s27 = scalar_lea.vmem %s422_s26, 256  ;;  %p424_p11 = scmp.lt.s32.totalorder %s629_s30, %s422_s26 }
  0x26   : > { %p419_p4 = pnand %p417_p2, %p403_p3  ;;  %p425_p5 = scmp.lt.s32.totalorder %s423_s27, %s416_s17 }
  0x28   : > { %p420_p12 = pneg %p419_p4  ;;  %p426_p8 = por %p425_p5, %p424_p11 }
  0x2a   : > { %p427_p9 = pnand %p426_p8, %p420_p12 }
  0x2c   : > { %430 = shalt.err (!%p427_p9)
}
  0x2d   : > { %355 = dma.hbm_to_vmem [thread:$0]  (!%p625_p13), %s619_s28, 128, %s629_s30, %s118_s4  }
  0x2e   : > { %p775_p0 = scmp.lt.s32.totalorder %s531_s12, 3  ;;  %p776_p1 = scmp.ge.s32.totalorder %s531_s12, 1 }
  0x2f   : > { %s672_s7 = scalar_lea.hbm %s766_s1, %s335_s24  ;;  %s139_s8 = scalar_lea.vmem [#allocation5], %s334_s25 }
  0x30   : > { %p663_p7 = pnand %p776_p1, %p775_p0  ;;  %s146_s14 = sshll.u32 %s139_s8, 4  ;;  %s147_s14 = int_to_ptr.vmem [resolvable:$true] %s146_s14 }
  0x31   : > { %s136_s28 = scalar_lea.sflag [#allocation6], %s610_s23  ;;  %s431_s30 = scalar_lea.hbm %s672_s7, 128 }
  0x32   : > { %s777_s29 = scalar_select %p663_p7, 1, 0 }
  0x33   : > { %p432_p11 = scmp.ne.s32.totalorder %s672_s7, %s431_s30  ;;  %s436_s24 = scalar_lea.hbm %s766_s1, 256 }
  0x34   : > { %p437_p2 = scmp.lt.u32.totalorder %s672_s7, %s766_s1  ;;  %p438_p4 = scmp.lt.u32.totalorder %s436_s24, %s431_s30 }
  0x35   : > { %p434_p12 = pnand %p432_p11, %p403_p3  ;;  %p440_p8 = scmp.lt.u32.totalorder %s431_s30, %s672_s7 }
  0x36   : > { %p439_p5 = por %p438_p4, %p437_p2 }
  0x37   : > { %p435_p10 = pneg %p434_p12 }
  0x38   : > { %p441_p9 = por %p440_p8, %p439_p5 }
  0x3a   : > { %p442_p0 = pnand %p441_p9, %p435_p10 }
  0x3c   : > { %445 = shalt.err (!%p442_p0)
}
  0x3d   : > { %s446_s23 = scalar_lea.vmem %s147_s14, 128  ;;  %s534_s25 = smov [#allocation5]  }
  0x3e   : > { %p447_p1 = scmp.ne.s32.totalorder %s147_s14, %s446_s23  ;;  %s451_s26 = sshll.u32 %s534_s25, 4  ;;  %s452_s26 = int_to_ptr.vmem [resolvable:$false] %s451_s26 }
  0x3f   : > { %s453_s27 = scalar_lea.vmem %s452_s26, 256  ;;  %p454_p6 = scmp.lt.s32.totalorder %s147_s14, %s452_s26 }
  0x40   : > { %p449_p11 = pnand %p447_p1, %p403_p3  ;;  %p455_p7 = scmp.lt.s32.totalorder %s453_s27, %s446_s23 }
  0x42   : > { %p450_p12 = pneg %p449_p11  ;;  %p456_p2 = por %p455_p7, %p454_p6 }
  0x44   : > { %p457_p4 = pnand %p456_p2, %p450_p12 }
  0x46   : > { %460 = shalt.err (!%p457_p4)
}
  0x47   : > { %358 = dma.hbm_to_vmem [thread:$0]  (!%p625_p13), %s672_s7, 128, %s147_s14, %s136_s28  }
  0x48   : > { %p778_p10 = scmp.ne.s32.totalorder %s777_s29, 0 }
  0x49   : > { %s699_s5 = sand.u32 (!%p778_p10), 1, %s523_s10   ;;  %p779_p6 = scmp.ne.s32.totalorder (!%p778_p10), %s771_s20, 0 }
  0x4a   : > { %155 = sbr.rel (%p778_p10) target bundleno = 138 (0x8a), region = 28  ;;  %s702_s6 = sshll.u32 (!%p778_p10), %s699_s5, 3 }
  0x4b   : > { %s158_s8 = scalar_lea.sflag (!%p778_p10), [#allocation3], %s699_s5  ;;  %s161_s30 = scalar_lea.vmem (!%p778_p10), [#allocation2], %s702_s6 }
  0x51   : > { %506 = dma.done.wait (%p779_p6), %s158_s8, 128  }
  0x52   : > { %508 = vsyncadd (%p779_p6), %s158_s8, 4294967168  ;;  %s167_s3 = scalar_lea.sflag [#allocation6], %s699_s5  ;;  %s170_s29 = scalar_lea.vmem [#allocation5], %s702_s6 }
  0x53   : > { %510 = dma.done.wait (%p779_p6), %s167_s3, 128  }
  0x54   : > { %512 = vsyncadd (%p779_p6), %s167_s3, 4294967168  ;;  %v196_v0 = vld [vmem:[%s161_s30] sm:$0xff]  ;;  %v197_v5 = vld [vmem:[%s170_s29] sm:$0xff]  ;;  %s195_s20 = scalar_lea.vmem [#allocation7], %s702_s6  ;;  %s343_s14 = sshll.u32 %s572_s13, 7 }
  0x55   : > { %v201_v1 = vand.u32 2147483647, %v196_v0  ;;  %v198_v7 = vmul.f32 %v197_v5, %v196_v0  ;;  %v215_v9 = vadd.f32 %v197_v5, %v196_v0  ;;  %v199_v12 = vmax.f32 %v196_v0, 0.0  ;;  %s238_s7 = sshll.u32 %s195_s20, 4  ;;  %s723_s16 = scalar_lea.hbm %s767_s2, %s343_s14  ;;  %s718_s7 = int_to_ptr.vmem [resolvable:$true] %s238_s7 }
  0x56   : > { %v220_v18 = vmul.f32 -0.5, %v197_v5  ;;  %s225_s24 = scalar_lea.sflag [#allocation4], %s699_s5  ;;  %s461_s17 = scalar_lea.vmem %s718_s7, 128 }
  0x57   : > { %v202_v2 = vsub.f32 0.0, %v201_v1  ;;  %v216_v10 = vmul.f32 2.0, %v198_v7  ;;  %v200_v17 = vsub.f32 %v199_v12, %v198_v7  ;;  %p462_p13 = scmp.ne.s32.totalorder %s718_s7, %s461_s17  ;;  %p780_p3 = scmp.ne.s32.totalorder %s772_s21, 0 }
  0x58   : > { %v221_v23 = vadd.f32 0.75, %v220_v18  ;;  %s535_s13 = smov [#allocation7]  }
  0x59   : > { %v203_v3 = vmul.f32 1.442695, %v202_v2  ;;  %v217_v14 = vsub.f32 %v215_v9, %v216_v10  ;;  %p463_p7 = pnand %p462_p13, %p780_p3  ;;  %s465_s19 = sshll.u32 %s535_s13, 4  ;;  %s466_s19 = int_to_ptr.vmem [resolvable:$false] %s465_s19 }
  0x5a   : > { %s467_s23 = scalar_lea.vmem %s466_s19, 256  ;;  %p468_p8 = scmp.lt.s32.totalorder %s718_s7, %s466_s19 }
  0x5b   : > { %397 = vpow2.f32 %v203_v3  ;;  %v218_v20 = vmul.f32 %v217_v14, %v217_v14  ;;  %p464_p5 = pneg %p463_p7  ;;  %p469_p9 = scmp.lt.s32.totalorder %s467_s23, %s461_s17 }
  0x5d   : > { %p470_p0 = por %p469_p9, %p468_p8 }
  0x5f   : > { %p471_p1 = pnand %p470_p0, %p464_p5 }
  0x65   : > { %v398_v4 = vpop.eup %397 }
  0x66   : > { %v205_v6 = vadd.f32 1.0, %v398_v4  ;;  %v208_v8 = vmul.f32 -0.5, %v398_v4  ;;  %v211_v13 = vand.u32 2147483647, %v398_v4 }
  0x68   : > { %399 = vlog2.f32 %v205_v6  ;;  %v209_v11 = vadd.f32 1.0, %v208_v8  ;;  %vm212_vm0 = vcmp.lt.f32.partialorder %v211_v13, 0.0004427343 }
  0x6a   : > { %v210_v15 = vmul.f32 %v398_v4, %v209_v11 }
  0x72   : > { %v400_v16 = vpop.eup %399 }
  0x73   : > { %v207_v19 = vmul.f32 0.6931472, %v400_v16 }
  0x75   : > { %v213_v21 = vsel %vm212_vm0, %v210_v15, %v207_v19 }
  0x76   : > { %v214_v22 = vadd.f32 %v213_v21, %v200_v17 }
  0x78   : > { %v219_v24 = vmul.f32 %v218_v20, %v214_v22 }
  0x7a   : > { %v222_v25 = vmul.f32 %v221_v23, %v219_v24 }
  0x7c   : > { %223 = vst [vmem:[%s195_s20] sm:$0xff] %v222_v25 }
  0x7d   : > { %474 = shalt.err (!%p471_p1)
}
  0x7e   : > { %s475_s25 = scalar_lea.hbm %s723_s16, 128  ;;  %s479_s5 = scalar_lea.hbm %s767_s2, 256 }
  0x7f   : > { %p476_p11 = scmp.ne.s32.totalorder %s723_s16, %s475_s25  ;;  %p480_p4 = scmp.lt.u32.totalorder %s723_s16, %s767_s2 }
  0x80   : > { %p481_p10 = scmp.lt.u32.totalorder %s479_s5, %s475_s25  ;;  %p483_p13 = scmp.lt.u32.totalorder %s475_s25, %s723_s16 }
  0x81   : > { %p477_p12 = pnand %p476_p11, %p780_p3 }
  0x82   : > { %p482_p6 = por %p481_p10, %p480_p4 }
  0x83   : > { %p478_p2 = pneg %p477_p12 }
  0x84   : > { %p484_p7 = por %p483_p13, %p482_p6 }
  0x86   : > { %p485_p5 = pnand %p484_p7, %p478_p2 }
  0x88   : > { %488 = shalt.err (!%p485_p5)
}
  0x89   : > { %350 = dma.vmem_to_hbm [thread:$0]  (%p780_p3), %s718_s7, 128, %s723_s16, %s225_s24  }
  0x8a PF: > { %s250_s30 = sand.u32 1, %s519_s9   ;;  %p781_p8 = scmp.ne.s32.totalorder %s773_s22, 0 }
  0x8b   : > { %p782_p9 = scmp.ge.s32.totalorder %s531_s12, 2  ;;  %s251_s3 = scalar_lea.sflag [#allocation4], %s250_s30 }
  0x8d   : > { %p360_p0 = pnand %p782_p9, %p781_p8 }
  0x8f   : > { %514 = dma.done.wait (!%p360_p0), %s251_s3, 128  }
  0x90   : > { %516 = vsyncadd (!%p360_p0), %s251_s3, 4294967168  ;;  %p18_p1 = scmp.ge.s32.totalorder %s576_s15, 4   ;;  %s783_s9 = smov %s523_s10 }
  0x91   : > { %s784_s10 = smov %s527_s11  ;;  %s785_s11 = smov %s588_s18 }
  0x92   : > { %s786_s12 = smov %s576_s15  ;;  %20 = sbr.rel (!%p18_p1) target bundleno = 7 (0x7), region = 86 }
  0x99   :  { %256 = vsyncpa [#allocation3], 1 }
  0x9a   :  { %258 = vsyncpa [#allocation3 + $0x1], 1 }
  0x9b   :  { %259 = vsyncpa [#allocation6], 1 }
  0x9c   :  { %261 = vsyncpa [#allocation6 + $0x1], 1 }
  0x9d   :  { %262 = vsyncpa [#allocation4], 1 }
  0x9e   :  { %264 = vsyncpa [#allocation4 + $0x1], 1 }

</bundles_post_ra>
